<compile_context>
chip_gen: v7x
topology: tpu7x:2x2x1
jax: 0.10.0
libtpu: 0.0.40
codegen_flags: <defaults>
</compile_context>

<pallas_src>
import math
import functools

import jax
import jax.numpy as jnp
import numpy as np
from jax import lax
from jax.experimental import pallas as pl
from jax.experimental.pallas import tpu as pltpu


# --------------------------------------------------------------------------------
# Kernels
# --------------------------------------------------------------------------------
def _qkv_proj_kernel(x_ref, wq_ref, wk_ref, wv_ref, bq_ref, bk_ref, bv_ref,
                     q_ref, k_ref, v_ref, *, compute_dtype):
    x = x_ref[0].astype(compute_dtype)                          # (tr, D_in)
    # Weights arrive already cast to compute_dtype (and Wq/bq pre-scaled by
    # 1/sqrt(head_dim)); accumulate in fp32, store in the intermediate dtype.
    q_ref[0] = (jnp.dot(x, wq_ref[...], preferred_element_type=jnp.float32)
                + bq_ref[...]).astype(q_ref.dtype)
    k_ref[0] = (jnp.dot(x, wk_ref[...], preferred_element_type=jnp.float32)
                + bk_ref[...]).astype(k_ref.dtype)
    v_ref[0] = (jnp.dot(x, wv_ref[...], preferred_element_type=jnp.float32)
                + bv_ref[...]).astype(v_ref.dtype)


def _flash_attn_kernel(q_ref, k_ref, v_ref, o_ref, m_scr, l_scr, acc_scr, *,
                       causal_mask, num_heads, head_dim, tq, tk, compute_dtype):
    qi = pl.program_id(1)
    ki = pl.program_id(2)

    @pl.when(ki == 0)
    def _init():
        m_scr[...] = jnp.full(m_scr.shape, -jnp.inf, m_scr.dtype)
        l_scr[...] = jnp.zeros(l_scr.shape, l_scr.dtype)
        acc_scr[...] = jnp.zeros(acc_scr.shape, acc_scr.dtype)

    def step(apply_mask):
        # Load whole (tq/tk, d_model) tiles once; per-head lane slices stay in
        # VMEM/vregs (no HBM round trips, no XLA transposes). q is pre-scaled.
        q_all = q_ref[0].astype(compute_dtype)                  # (tq, d_model)
        k_all = k_ref[0].astype(compute_dtype)                  # (tk, d_model)
        v_all = v_ref[0].astype(compute_dtype)                  # (tk, d_model)
        if apply_mask:
            row = qi * tq + lax.broadcasted_iota(jnp.int32, (tq, tk), 0)
            col = ki * tk + lax.broadcasted_iota(jnp.int32, (tq, tk), 1)
            keep = col <= row                                   # built once per step
        for h in range(num_heads):                              # static unroll
            sl = slice(h * head_dim, (h + 1) * head_dim)
            q_h, k_h, v_h = q_all[:, sl], k_all[:, sl], v_all[:, sl]
            # QK^T contracting the head dim directly (no transposed copy of K).
            s = lax.dot_general(q_h, k_h, (((1,), (1,)), ((), ())),
                                preferred_element_type=jnp.float32)   # (tq, tk) f32
            if apply_mask:
                s = jnp.where(keep, s, jnp.float32(-9e15))
            # Online (flash) softmax update, fp32.
            m_prev = m_scr[h]
            m_new = jnp.maximum(m_prev, jnp.max(s, axis=-1, keepdims=True))
            alpha = jnp.exp(m_prev - m_new)
            p = jnp.exp(s - m_new)
            l_scr[h] = alpha * l_scr[h] + jnp.sum(p, axis=-1, keepdims=True)
            acc_scr[h] = alpha * acc_scr[h] + jnp.dot(
                p.astype(compute_dtype), v_h, preferred_element_type=jnp.float32)
            m_scr[h] = m_new

    if causal_mask:
        row_first = qi * tq
        row_last = qi * tq + (tq - 1)
        col_first = ki * tk
        col_last = ki * tk + (tk - 1)

        @pl.when(col_last <= row_first)              # fully visible: no mask work
        def _():
            step(False)

        @pl.when((col_first <= row_last) & (col_last > row_first))  # straddles diag
        def _():
            step(True)
        # Tiles with col_first > row_last are fully masked and skipped entirely.
    else:
        step(False)

    @pl.when(ki == pl.num_programs(2) - 1)
    def _finalize():
        for h in range(num_heads):
            inv_l = pl.reciprocal(l_scr[h], approx=False)       # once per q tile
            o_ref[0, :, h * head_dim:(h + 1) * head_dim] = (
                acc_scr[h] * inv_l).astype(o_ref.dtype)


def _out_proj_kernel(a_ref, wo_ref, bo_ref, o_ref, *, compute_dtype):
    a = a_ref[0].astype(compute_dtype)                          # (tr, d_model)
    o_ref[0] = (jnp.dot(a, wo_ref[...], preferred_element_type=jnp.float32)
                + bo_ref[...]).astype(o_ref.dtype)


# --------------------------------------------------------------------------------
# Wrapper
# --------------------------------------------------------------------------------
def _pick_seq_tile(dim, preferred, multiple=8):
    """Largest divisor of `dim` that is <= preferred and a multiple of 8."""
    best = None
    for t in range(multiple, min(preferred, dim) + 1, multiple):
        if dim % t == 0:
            best = t
    # TODO(synk): dims with no 8-multiple divisor <= preferred fall back to the
    # full extent; proper fix is cdiv grids + in-kernel tail masking.
    return best if best is not None else dim


def _pick_feature_tile(dim, preferred=512):
    """Largest 128-multiple divisor of `dim` <= preferred, or the full dim."""
    if dim <= preferred:
        return dim
    best = None
    for t in range(128, preferred + 1, 128):
        if dim % t == 0:
            best = t
    return best if best is not None else dim


def _vmem_limit(bytes_needed, headroom=8 << 20):
    return int(min(max(bytes_needed + headroom, 32 << 20), 128 << 20))


def multi_head_self_attention(x, params, *, num_heads: int, causal_mask: bool = False,
                              compute_dtype=jnp.bfloat16,
                              q_tile: int = 512, kv_tile: int = 512,
                              row_tile: int = 512, feature_tile: int = 512):
    """x: (B, S, D_in). params: projection weights (stored (in, out)) and biases."""
    B, S, D_in = x.shape
    d_model = params["wq"].shape[1]
    assert d_model % num_heads == 0
    head_dim = d_model // num_heads

    tr = _pick_seq_tile(S, row_tile)
    tq = _pick_seq_tile(S, q_tile)
    tk = _pick_seq_tile(S, kv_tile)
    tn = _pick_feature_tile(d_model, feature_tile)

    c_is = jnp.dtype(compute_dtype).itemsize
    x_is = jnp.dtype(x.dtype).itemsize

    # Fold 1/sqrt(head_dim) into the Q projection (weights + bias) and pre-cast all
    # weights to the MXU compute dtype (halves weight HBM traffic when bf16).
    scale = 1.0 / math.sqrt(head_dim)
    wq = (params["wq"] * scale).astype(compute_dtype)
    wk = params["wk"].astype(compute_dtype)
    wv = params["wv"].astype(compute_dtype)
    wo = params["wo"].astype(compute_dtype)
    bq = (params["bq"] * scale).astype(jnp.float32)
    bk = params["bk"].astype(jnp.float32)
    bv = params["bv"].astype(jnp.float32)
    bo = params["bo"].astype(jnp.float32)

    # ---------------- 1) QKV projections (feature-tiled over d_model) ------------
    qkv_bytes = (2 * (tr * D_in * x_is + 3 * D_in * tn * c_is + 3 * tn * 4
                      + 3 * tr * tn * c_is) + 3 * tr * tn * 4)
    q, k, v = pl.pallas_call(
        functools.partial(_qkv_proj_kernel, compute_dtype=compute_dtype),
        out_shape=tuple(jax.ShapeDtypeStruct((B, S, d_model), compute_dtype)
                        for _ in range(3)),
        grid_spec=pltpu.PrefetchScalarGridSpec(
            num_scalar_prefetch=0,
            grid=(B, S // tr, d_model // tn),
            in_specs=[
                pl.BlockSpec((1, tr, D_in), lambda b, i, n: (b, i, 0)),   # x (resident over n)
                pl.BlockSpec((D_in, tn), lambda b, i, n: (0, n)),         # Wq
                pl.BlockSpec((D_in, tn), lambda b, i, n: (0, n)),         # Wk
                pl.BlockSpec((D_in, tn), lambda b, i, n: (0, n)),         # Wv
                pl.BlockSpec((1, tn), lambda b, i, n: (0, n)),            # bq
                pl.BlockSpec((1, tn), lambda b, i, n: (0, n)),            # bk
                pl.BlockSpec((1, tn), lambda b, i, n: (0, n)),            # bv
            ],
            out_specs=tuple(pl.BlockSpec((1, tr, tn), lambda b, i, n: (b, i, n))
                            for _ in range(3)),
        ),
        compiler_params=pltpu.CompilerParams(
            dimension_semantics=("parallel", "parallel", "parallel"),
            vmem_limit_bytes=_vmem_limit(qkv_bytes)),
    )(x, wq, wk, wv, bq, bk, bv)

    # ---------------- 2) Flash attention (all heads per grid step) ---------------
    attn_bytes = (2 * (2 * tq * d_model * c_is + 2 * tk * d_model * c_is)   # q/k/v/o blocks, 2x buffered
                  + 4 * (2 * num_heads * tq * 128                           # m/l scratch (lane-padded)
                         + num_heads * tq * max(head_dim, 128))             # acc scratch
                  + 3 * tq * d_model * c_is + 6 * tq * tk * 4)              # s/p and head temporaries
    attn = pl.pallas_call(
        functools.partial(_flash_attn_kernel, causal_mask=causal_mask,
                          num_heads=num_heads, head_dim=head_dim, tq=tq, tk=tk,
                          compute_dtype=compute_dtype),
        out_shape=jax.ShapeDtypeStruct((B, S, d_model), compute_dtype),
        grid_spec=pltpu.PrefetchScalarGridSpec(
            num_scalar_prefetch=0,
            grid=(B, S // tq, S // tk),
            in_specs=[
                pl.BlockSpec((1, tq, d_model), lambda b, qi, ki: (b, qi, 0)),
                pl.BlockSpec((1, tk, d_model), lambda b, qi, ki: (b, ki, 0)),
                pl.BlockSpec((1, tk, d_model), lambda b, qi, ki: (b, ki, 0)),
            ],
            out_specs=pl.BlockSpec((1, tq, d_model), lambda b, qi, ki: (b, qi, 0)),
            scratch_shapes=[
                pltpu.VMEM((num_heads, tq, 1), jnp.float32),          # running max
                pltpu.VMEM((num_heads, tq, 1), jnp.float32),          # running sum
                pltpu.VMEM((num_heads, tq, head_dim), jnp.float32),   # acc
            ],
        ),
        compiler_params=pltpu.CompilerParams(
            dimension_semantics=("parallel", "parallel", "arbitrary"),
            vmem_limit_bytes=_vmem_limit(attn_bytes)),
    )(q, k, v)

    # ---------------- 3) Output projection (feature-tiled over d_model) ----------
    out_bytes = (2 * (tr * d_model * c_is + d_model * tn * c_is + tn * 4
                      + tr * tn * x_is) + 2 * tr * tn * 4)
    out = pl.pallas_call(
        functools.partial(_out_proj_kernel, compute_dtype=compute_dtype),
        out_shape=jax.ShapeDtypeStruct((B, S, d_model), x.dtype),
        grid_spec=pltpu.PrefetchScalarGridSpec(
            num_scalar_prefetch=0,
            grid=(B, S // tr, d_model // tn),
            in_specs=[
                pl.BlockSpec((1, tr, d_model), lambda b, i, n: (b, i, 0)),  # attn (concat layout)
                pl.BlockSpec((d_model, tn), lambda b, i, n: (0, n)),        # Wo
                pl.BlockSpec((1, tn), lambda b, i, n: (0, n)),              # bo
            ],
            out_specs=pl.BlockSpec((1, tr, tn), lambda b, i, n: (b, i, n)),
        ),
        compiler_params=pltpu.CompilerParams(
            dimension_semantics=("parallel", "parallel", "parallel"),
            vmem_limit_bytes=_vmem_limit(out_bytes)),
    )(attn, wo, bo)

    return out


# ---------------- parameter init (deterministic, xavier-uniform style) -----------
def _xavier_uniform(key, fan_in, fan_out):
    bound = math.sqrt(6.0 / (fan_in + fan_out))
    # stored as (in, out) so forward is x @ W
    return jax.random.uniform(key, (fan_in, fan_out), jnp.float32, -bound, bound)


def init_params(key, input_dim, d_model):
    kq, kk, kv, ko = jax.random.split(key, 4)
    return {
        "wq": _xavier_uniform(kq, input_dim, d_model),
        "wk": _xavier_uniform(kk, input_dim, d_model),
        "wv": _xavier_uniform(kv, input_dim, d_model),
        "wo": _xavier_uniform(ko, d_model, d_model),
        "bq": jnp.zeros((1, d_model), jnp.float32),
        "bk": jnp.zeros((1, d_model), jnp.float32),
        "bv": jnp.zeros((1, d_model), jnp.float32),
        "bo": jnp.zeros((1, d_model), jnp.float32),
    }


# ---------------- pure-JAX reference (mirrors the PyTorch forward) ----------------
def reference(x, params, num_heads, causal_mask=False):
    B, S, _ = x.shape
    d_model = params["wq"].shape[1]
    hd = d_model // num_heads
    q = x @ params["wq"] + params["bq"]
    k = x @ params["wk"] + params["bk"]
    v = x @ params["wv"] + params["bv"]
    q = q.reshape(B, S, num_heads, hd).transpose(0, 2, 1, 3)
    k = k.reshape(B, S, num_heads, hd).transpose(0, 2, 1, 3)
    v = v.reshape(B, S, num_heads, hd).transpose(0, 2, 1, 3)
    s = jnp.einsum("bhqd,bhkd->bhqk", q, k) / math.sqrt(hd)
    if causal_mask:
        mask = jnp.tril(jnp.ones((S, S)))
        s = jnp.where(mask == 0, -9e15, s)
    p = jax.nn.softmax(s, axis=-1)
    wv = jnp.einsum("bhqk,bhkd->bhqd", p, v)
    wv = wv.transpose(0, 2, 1, 3).reshape(B, S, d_model)
    return wv @ params["wo"] + params["bo"]


if __name__ == "__main__":
    B, S, input_dim, d_model, num_heads = 2, 8, 32, 32, 4
    key = jax.random.PRNGKey(0)
    kx, kp = jax.random.split(key)
    x = jax.random.normal(kx, (B, S, input_dim), jnp.float32)
    params = init_params(kp, input_dim, d_model)

    for causal in (False, True):
        ref = reference(x, params, num_heads, causal_mask=causal)

        # fp32 MXU path: tight tolerance.
        out_f32 = multi_head_self_attention(x, params, num_heads=num_heads,
                                            causal_mask=causal,
                                            compute_dtype=jnp.float32)
        out_f32 = jax.block_until_ready(out_f32)
        np.testing.assert_allclose(np.asarray(out_f32), np.asarray(ref),
                                   atol=1e-4, rtol=1e-4)

        # Default bf16 MXU path (fp32 accumulation / softmax): loose tolerance since
        # every matmul operand of the 3-stage pipeline is rounded to bf16.
        out_bf16 = multi_head_self_attention(x, params, num_heads=num_heads,
                                             causal_mask=causal)
        out_bf16 = jax.block_until_ready(out_bf16)
        np.testing.assert_allclose(np.asarray(out_bf16), np.asarray(ref),
                                   atol=1e-1, rtol=1e-1)

    print("KERNEL_OK")
</pallas_src>

<mosaic_0001>
module attributes {stable_mosaic.version = 11 : i64} {
  func.func @_qkv_proj_kernel(%arg0: i32, %arg1: i32, %arg2: i32, %arg3: memref<1x8x32xf32, #tpu.memory_space<vmem>>, %arg4: memref<32x32xf32, #tpu.memory_space<vmem>>, %arg5: memref<32x32xf32, #tpu.memory_space<vmem>>, %arg6: memref<32x32xf32, #tpu.memory_space<vmem>>, %arg7: memref<1x32xf32, #tpu.memory_space<vmem>>, %arg8: memref<1x32xf32, #tpu.memory_space<vmem>>, %arg9: memref<1x32xf32, #tpu.memory_space<vmem>>, %arg10: memref<1x8x32xf32, #tpu.memory_space<vmem>>, %arg11: memref<1x8x32xf32, #tpu.memory_space<vmem>>, %arg12: memref<1x8x32xf32, #tpu.memory_space<vmem>>) attributes {dimension_semantics = [#tpu.dimension_semantics<parallel>, #tpu.dimension_semantics<parallel>, #tpu.dimension_semantics<parallel>], iteration_bounds = array<i64: 2, 1, 1>, scalar_prefetch = 0 : i64, scratch_operands = 0 : i64, tpu.core_type = #tpu.core_type<tc>, window_params = [{transform_indices = @transform_0, window_bounds = array<i64: 1, 8, 32>}, {transform_indices = @transform_1, window_bounds = array<i64: 32, 32>}, {transform_indices = @transform_2, window_bounds = array<i64: 32, 32>}, {transform_indices = @transform_3, window_bounds = array<i64: 32, 32>}, {transform_indices = @transform_4, window_bounds = array<i64: 1, 32>}, {transform_indices = @transform_5, window_bounds = array<i64: 1, 32>}, {transform_indices = @transform_6, window_bounds = array<i64: 1, 32>}, {transform_indices = @transform_7, window_bounds = array<i64: 1, 8, 32>}, {transform_indices = @transform_8, window_bounds = array<i64: 1, 8, 32>}, {transform_indices = @transform_9, window_bounds = array<i64: 1, 8, 32>}]} {
    %c0 = arith.constant 0 : index
    %c0_0 = arith.constant 0 : index
    %c0_1 = arith.constant 0 : index
    %0 = vector.load %arg3[%c0, %c0_0, %c0_1] : memref<1x8x32xf32, #tpu.memory_space<vmem>>, vector<1x8x32xf32>
    %1 = vector.shape_cast %0 : vector<1x8x32xf32> to vector<8x32xf32>
    %c0_2 = arith.constant 0 : index
    %c0_3 = arith.constant 0 : index
    %2 = vector.load %arg4[%c0_2, %c0_3] : memref<32x32xf32, #tpu.memory_space<vmem>>, vector<32x32xf32>
    %cst = arith.constant dense<0.000000e+00> : vector<8x32xf32>
    %3 = tpu.matmul %1, %2, %cst {dimension_numbers = #tpu.dot_dimension_numbers<[1], [0], [0], [1], [0, 0, 1, 1], [], []>} : vector<8x32xf32>, vector<32x32xf32>, vector<8x32xf32> -> vector<8x32xf32>
    %c0_4 = arith.constant 0 : index
    %c0_5 = arith.constant 0 : index
    %4 = vector.load %arg7[%c0_4, %c0_5] : memref<1x32xf32, #tpu.memory_space<vmem>>, vector<1x32xf32>
    %5 = vector.broadcast %4 : vector<1x32xf32> to vector<8x32xf32>
    %6 = arith.addf %3, %5 : vector<8x32xf32>
    %c0_6 = arith.constant 0 : index
    %c0_7 = arith.constant 0 : index
    %c0_8 = arith.constant 0 : index
    %7 = vector.load %arg10[%c0_6, %c0_7, %c0_8] : memref<1x8x32xf32, #tpu.memory_space<vmem>>, vector<1x8x32xf32>
    %8 = vector.shape_cast %7 : vector<1x8x32xf32> to vector<8x32xf32>
    %9 = vector.shape_cast %6 : vector<8x32xf32> to vector<1x8x32xf32>
    tpu.vector_store %arg10[%c0_6, %c0_7, %c0_8], %9 {strides = array<i32>} : memref<1x8x32xf32, #tpu.memory_space<vmem>>, vector<1x8x32xf32>,
    %c0_9 = arith.constant 0 : index
    %c0_10 = arith.constant 0 : index
    %10 = vector.load %arg5[%c0_9, %c0_10] : memref<32x32xf32, #tpu.memory_space<vmem>>, vector<32x32xf32>
    %cst_11 = arith.constant dense<0.000000e+00> : vector<8x32xf32>
    %11 = tpu.matmul %1, %10, %cst_11 {dimension_numbers = #tpu.dot_dimension_numbers<[1], [0], [0], [1], [0, 0, 1, 1], [], []>} : vector<8x32xf32>, vector<32x32xf32>, vector<8x32xf32> -> vector<8x32xf32>
    %c0_12 = arith.constant 0 : index
    %c0_13 = arith.constant 0 : index
    %12 = vector.load %arg8[%c0_12, %c0_13] : memref<1x32xf32, #tpu.memory_space<vmem>>, vector<1x32xf32>
    %13 = vector.broadcast %12 : vector<1x32xf32> to vector<8x32xf32>
    %14 = arith.addf %11, %13 : vector<8x32xf32>
    %c0_14 = arith.constant 0 : index
    %c0_15 = arith.constant 0 : index
    %c0_16 = arith.constant 0 : index
    %15 = vector.load %arg11[%c0_14, %c0_15, %c0_16] : memref<1x8x32xf32, #tpu.memory_space<vmem>>, vector<1x8x32xf32>
    %16 = vector.shape_cast %15 : vector<1x8x32xf32> to vector<8x32xf32>
    %17 = vector.shape_cast %14 : vector<8x32xf32> to vector<1x8x32xf32>
    tpu.vector_store %arg11[%c0_14, %c0_15, %c0_16], %17 {strides = array<i32>} : memref<1x8x32xf32, #tpu.memory_space<vmem>>, vector<1x8x32xf32>,
    %c0_17 = arith.constant 0 : index
    %c0_18 = arith.constant 0 : index
    %18 = vector.load %arg6[%c0_17, %c0_18] : memref<32x32xf32, #tpu.memory_space<vmem>>, vector<32x32xf32>
    %cst_19 = arith.constant dense<0.000000e+00> : vector<8x32xf32>
    %19 = tpu.matmul %1, %18, %cst_19 {dimension_numbers = #tpu.dot_dimension_numbers<[1], [0], [0], [1], [0, 0, 1, 1], [], []>} : vector<8x32xf32>, vector<32x32xf32>, vector<8x32xf32> -> vector<8x32xf32>
    %c0_20 = arith.constant 0 : index
    %c0_21 = arith.constant 0 : index
    %20 = vector.load %arg9[%c0_20, %c0_21] : memref<1x32xf32, #tpu.memory_space<vmem>>, vector<1x32xf32>
    %21 = vector.broadcast %20 : vector<1x32xf32> to vector<8x32xf32>
    %22 = arith.addf %19, %21 : vector<8x32xf32>
    %c0_22 = arith.constant 0 : index
    %c0_23 = arith.constant 0 : index
    %c0_24 = arith.constant 0 : index
    %23 = vector.load %arg12[%c0_22, %c0_23, %c0_24] : memref<1x8x32xf32, #tpu.memory_space<vmem>>, vector<1x8x32xf32>
    %24 = vector.shape_cast %23 : vector<1x8x32xf32> to vector<8x32xf32>
    %25 = vector.shape_cast %22 : vector<8x32xf32> to vector<1x8x32xf32>
    tpu.vector_store %arg12[%c0_22, %c0_23, %c0_24], %25 {strides = array<i32>} : memref<1x8x32xf32, #tpu.memory_space<vmem>>, vector<1x8x32xf32>,
    return
  }
  func.func @transform_0(%arg0: i32, %arg1: i32, %arg2: i32) -> (i32, i32, i32) {
    %c0_i32 = arith.constant 0 : i32
    %c0_i32_0 = arith.constant 0 : i32
    return %arg0, %arg1, %c0_i32 : i32, i32, i32
  }
  func.func @transform_1(%arg0: i32, %arg1: i32, %arg2: i32) -> (i32, i32) {
    %c0_i32 = arith.constant 0 : i32
    %c0_i32_0 = arith.constant 0 : i32
    return %c0_i32, %arg2 : i32, i32
  }
  func.func @transform_2(%arg0: i32, %arg1: i32, %arg2: i32) -> (i32, i32) {
    %c0_i32 = arith.constant 0 : i32
    %c0_i32_0 = arith.constant 0 : i32
    return %c0_i32, %arg2 : i32, i32
  }
  func.func @transform_3(%arg0: i32, %arg1: i32, %arg2: i32) -> (i32, i32) {
    %c0_i32 = arith.constant 0 : i32
    %c0_i32_0 = arith.constant 0 : i32
    return %c0_i32, %arg2 : i32, i32
  }
  func.func @transform_4(%arg0: i32, %arg1: i32, %arg2: i32) -> (i32, i32) {
    %c0_i32 = arith.constant 0 : i32
    %c0_i32_0 = arith.constant 0 : i32
    return %c0_i32, %arg2 : i32, i32
  }
  func.func @transform_5(%arg0: i32, %arg1: i32, %arg2: i32) -> (i32, i32) {
    %c0_i32 = arith.constant 0 : i32
    %c0_i32_0 = arith.constant 0 : i32
    return %c0_i32, %arg2 : i32, i32
  }
  func.func @transform_6(%arg0: i32, %arg1: i32, %arg2: i32) -> (i32, i32) {
    %c0_i32 = arith.constant 0 : i32
    %c0_i32_0 = arith.constant 0 : i32
    return %c0_i32, %arg2 : i32, i32
  }
  func.func @transform_7(%arg0: i32, %arg1: i32, %arg2: i32) -> (i32, i32, i32) {
    %c0_i32 = arith.constant 0 : i32
    return %arg0, %arg1, %arg2 : i32, i32, i32
  }
  func.func @transform_8(%arg0: i32, %arg1: i32, %arg2: i32) -> (i32, i32, i32) {
    %c0_i32 = arith.constant 0 : i32
    return %arg0, %arg1, %arg2 : i32, i32, i32
  }
  func.func @transform_9(%arg0: i32, %arg1: i32, %arg2: i32) -> (i32, i32, i32) {
    %c0_i32 = arith.constant 0 : i32
    return %arg0, %arg1, %arg2 : i32, i32, i32
  }
}

</mosaic_0001>

<bundles_post_ra>
// kernel: tpu_custom_call.1
= control target key start
LH: loop header
LB: loop body
LE: loop exit
PB: predicated region body
PF: predicated region fallthrough
CT: control target
= control target key end

     0   :  { %s1942_s0 = inlined_call_operand.hbm [shape: f32[2,8,32], index: 0, kind: input, shape index: {}]   ;;  %s1943_s1 = inlined_call_operand.hbm [shape: f32[32,32], index: 1, kind: input, shape index: {}]   ;;  %s1944_s2 = inlined_call_operand.hbm [shape: f32[32,32], index: 2, kind: input, shape index: {}]   ;;  %s1945_s3 = inlined_call_operand.hbm [shape: f32[32,32], index: 3, kind: input, shape index: {}]   ;;  %s1946_s4 = inlined_call_operand.vmem [shape: f32[1,32], index: 4, kind: input, shape index: {}]   ;;  %s1947_s5 = inlined_call_operand.vmem [shape: f32[1,32], index: 5, kind: input, shape index: {}]   ;;  %s1948_s6 = inlined_call_operand.vmem [shape: f32[1,32], index: 6, kind: input, shape index: {}]   ;;  %s1949_s7 = inlined_call_operand.hbm [shape: f32[2,8,32], index: 7, kind: output, shape index: {0}]   ;;  %s1950_s8 = inlined_call_operand.hbm [shape: f32[2,8,32], index: 8, kind: output, shape index: {1}]   ;;  %s1951_s9 = inlined_call_operand.hbm [shape: f32[2,8,32], index: 9, kind: output, shape index: {2}]  }
   0x1   :  { %1960 = sst [smem:[#allocation21_spill]] %s1942_s0 }
   0x2   :  { %1961 = sst [smem:[#allocation22_spill]] %s1948_s6 }
   0x3   :  { %1962 = sst [smem:[#allocation23_spill]] %s1950_s8 }
   0x4   :  { %1963 = sst [smem:[#allocation24_spill]] %s1951_s9 }
   0x5   :  { %15 = vsyncpa [#allocation3], 0 }
   0x6   :  { %17 = vsyncpa [#allocation3 + $0x1], 0 }
   0x7   :  { %18 = vsyncpa [#allocation6], 0 }
   0x8   :  { %19 = vsyncpa [#allocation9], 0 }
   0x9   :  { %20 = vsyncpa [#allocation4], 0 }
   0xa   :  { %22 = vsyncpa [#allocation4 + $0x1], 0 }
   0xb   :  { %23 = vsyncpa [#allocation12], 0 }
   0xc   :  { %25 = vsyncpa [#allocation12 + $0x1], 0  ;;  %s1570_s30 = smov 0   ;;  %s1572_s10 = smov 0  }
   0xd   :  { %s1574_s11 = smov 0   ;;  %s1576_s12 = smov 0  }
   0xe   :  { %s1578_s13 = smov 0   ;;  %s1580_s14 = smov 0  }
   0xf LB: > { %1964 = sst [smem:[#allocation19_spill]] %s1486_s30  ;;  %s1601_s15 = sadd.s32 4294967295, %s1506_s14   ;;  %s1506_s14 = sphi %s1580_s14, %s31_s14   ;;  %s1502_s13 = sphi %s1578_s13, %s1994_s13   ;;  %s1498_s12 = sphi %s1576_s12, %s1993_s12   ;;  %s1494_s11 = sphi %s1574_s11, %s1992_s11   ;;  %s1490_s10 = sphi %s1572_s10, %s1991_s10   ;;  %s1486_s30 = sphi %s1570_s30, %s1990_s30  }
  0x10   : > { %s1952_s16 = sadd.s32 4294967294, %s1506_s14   ;;  %p72_p0 = scmp.ne.s32.totalorder %s1490_s10, %s1486_s30 }
  0x11   : > { %p1954_p1 = scmp.eq.s32.totalorder %s1601_s15, 0  ;;  %p262_p3 = scmp.eq.s32.totalorder %s1952_s16, 1 }
  0x12   : > { %p1036_p5 = scmp.ge.s32.totalorder %s1506_s14, 1  ;;  %p329_p7 = scmp.lt.s32.totalorder %s1506_s14, 3 }
  0x13   : > { %p1612_p4 = por %p1954_p1, %p72_p0  ;;  %p1617_p6 = por %p262_p3, %p72_p0 }
  0x14   : > { %p1622_p8 = pnand %p1036_p5, %p329_p7  ;;  %s1508_s20 = smov [#allocation5]  }
  0x15   : > { %s1965_s17 = scalar_select %p1612_p4, 1, 0 }
  0x16   : > { %s1966_s18 = scalar_select %p1617_p6, 1, 0 }
  0x17   : > { %s1968_s19 = scalar_select %p1622_p8, 1, 0 }
  0x18   : > { %1967 = sst [smem:[#allocation20_spill]] %s1966_s18  ;;  %s343_s21 = sshll.u32 %s1508_s20, 4  ;;  %s1626_s21 = int_to_ptr.vmem [resolvable:$true] %s343_s21 }
  0x19   : > { %p1154_p9 = pneg %p1622_p8  ;;  %s1509_s23 = smov [#allocation7]  }
  0x1a   : > { %s358_s24 = sshll.u32 %s1509_s23, 4  ;;  %s1510_s25 = smov [#allocation8]   ;;  %s1637_s24 = int_to_ptr.vmem [resolvable:$true] %s358_s24 }
  0x1b   : > { %p1633_p11 = pnand %p1154_p9, %p1954_p1  ;;  %s1639_s26 = sshll.u32 %s1510_s25, 4  ;;  %s374_s26 = int_to_ptr.vmem [resolvable:$true] %s1639_s26 }
  0x1c   : > { %s1242_s29 = scalar_lea.hbm %s1943_s1, 512 }
  0x1d   : > { %p1243_p12 = scmp.ne.s32.totalorder %s1943_s1, %s1242_s29  ;;  %p1649_p13 = pneg %p1633_p11 }
  0x1e   : > { %p1249_p5 = scmp.lt.u32.totalorder %s1242_s29, %s1943_s1 }
  0x1f   : > { %p1245_p0 = pnand %p1649_p13, %p1243_p12 }
  0x21   : > { %p1246_p3 = pneg %p1245_p0 }
  0x23   : > { %p1251_p7 = pnand %p1249_p5, %p1246_p3 }
  0x25   : > { %1254 = shalt.err (!%p1251_p7)
}
  0x26   : > { %s1255_s16 = scalar_lea.vmem %s1626_s21, 512  ;;  %p1263_p2 = scmp.lt.s32.totalorder %s1626_s21, %s1626_s21 }
  0x27   : > { %p1256_p9 = scmp.ne.s32.totalorder %s1626_s21, %s1255_s16  ;;  %p1264_p6 = scmp.lt.s32.totalorder %s1255_s16, %s1255_s16 }
  0x29   : > { %p1258_p10 = pnand %p1256_p9, %p1649_p13  ;;  %p1265_p12 = por %p1264_p6, %p1263_p2 }
  0x2b   : > { %p1259_p1 = pneg %p1258_p10 }
  0x2d   : > { %p1266_p0 = pnand %p1265_p12, %p1259_p1 }
  0x2f   : > { %1269 = shalt.err (!%p1266_p0)
}
  0x30   : > { %s1511_s27 = smov 128   ;;  %s1512_s28 = smov 8  }
  0x31   : > { %1157 = dma.hbm_to_vmem [thread:$0]  (!%p1633_p11), %s1943_s1, 512, %s1626_s21, [#allocation6], %s1511_s27, %s1511_s27, %s1512_s28  }
  0x32   : > { %s1270_s16 = scalar_lea.hbm %s1944_s2, 512 }
  0x33   : > { %p1271_p1 = scmp.ne.s32.totalorder %s1944_s2, %s1270_s16  ;;  %p1277_p10 = scmp.lt.u32.totalorder %s1270_s16, %s1944_s2 }
  0x35   : > { %p1273_p2 = pnand %p1271_p1, %p1649_p13 }
  0x37   : > { %p1274_p6 = pneg %p1273_p2 }
  0x39   : > { %p1279_p3 = pnand %p1277_p10, %p1274_p6 }
  0x3b   : > { %1282 = shalt.err (!%p1279_p3)
}
  0x3c   : > { %s1283_s21 = scalar_lea.vmem %s1637_s24, 512  ;;  %p1291_p12 = scmp.lt.s32.totalorder %s1637_s24, %s1637_s24 }
  0x3d   : > { %p1284_p5 = scmp.ne.s32.totalorder %s1637_s24, %s1283_s21  ;;  %p1292_p0 = scmp.lt.s32.totalorder %s1283_s21, %s1283_s21 }
  0x3f   : > { %p1286_p7 = pnand %p1284_p5, %p1649_p13  ;;  %p1293_p1 = por %p1292_p0, %p1291_p12 }
  0x41   : > { %p1287_p9 = pneg %p1286_p7 }
  0x43   : > { %p1294_p2 = pnand %p1293_p1, %p1287_p9 }
  0x45   : > { %1297 = shalt.err (!%p1294_p2)
}
  0x46   : > { %1160 = dma.hbm_to_vmem [thread:$0]  (!%p1633_p11), %s1944_s2, 512, %s1637_s24, [#allocation6], %s1511_s27, %s1511_s27, %s1512_s28  }
  0x47   : > { %s1298_s29 = scalar_lea.hbm %s1945_s3, 512 }
  0x48   : > { %p1299_p6 = scmp.ne.s32.totalorder %s1945_s3, %s1298_s29  ;;  %p1305_p5 = scmp.lt.u32.totalorder %s1298_s29, %s1945_s3 }
  0x4a   : > { %p1301_p10 = pnand %p1299_p6, %p1649_p13 }
  0x4c   : > { %p1302_p3 = pneg %p1301_p10 }
  0x4e   : > { %p1307_p7 = pnand %p1305_p5, %p1302_p3 }
  0x50   : > { %1310 = shalt.err (!%p1307_p7)
}
  0x51   : > { %s1311_s21 = scalar_lea.vmem %s374_s26, 512  ;;  %p1319_p1 = scmp.lt.s32.totalorder %s374_s26, %s374_s26 }
  0x52   : > { %p1312_p9 = scmp.ne.s32.totalorder %s374_s26, %s1311_s21  ;;  %p1320_p2 = scmp.lt.s32.totalorder %s1311_s21, %s1311_s21 }
  0x54   : > { %p1314_p12 = pnand %p1312_p9, %p1649_p13  ;;  %p1321_p4 = por %p1320_p2, %p1319_p1 }
  0x56   : > { %p1315_p0 = pneg %p1314_p12 }
  0x58   : > { %p1322_p8 = pnand %p1321_p4, %p1315_p0 }
  0x5a   : > { %1325 = shalt.err (!%p1322_p8)
}
  0x5b   : > { %1163 = dma.hbm_to_vmem [thread:$0]  (!%p1633_p11), %s1945_s3, 512, %s374_s26, [#allocation9], %s1511_s27, %s1511_s27, %s1512_s28  }
  0x5c   : > { %s59_s18 = sadd.s32 1, %s1494_s11  ;;  %s50_s22 = sadd.s32 1, %s1502_s13 }
  0x5d   : > { %p66_p4 = scmp.ne.s32.totalorder %s1494_s11, %s1490_s10  ;;  %p52_p8 = scmp.ge.s32.totalorder %s50_s22, 2 }
  0x5e   : > { %p67_p13 = scmp.eq.s32.totalorder %s1506_s14, 0  ;;  %p1971_p6 = scmp.eq.s32.totalorder %s1601_s15, 1 }
  0x5f   : > { %p1181_p3 = scmp.lt.s32.totalorder %s1506_s14, 2  ;;  %s1996_s22 = smov (%p52_p8, %s50_s22), 0 }
  0x60   : > { %p1728_p10 = por %p1971_p6, %p66_p4  ;;  %p68_p5 = por %p67_p13, %p66_p4 }
  0x61   : > { %s405_s9 = sand.u32 1, %s1494_s11   ;;  %s54_s30 = ssub.s32 %s1502_s13, %s1996_s22 }
  0x62   : > { %p57_p7 = scmp.eq.s32.totalorder %s54_s30, 0  ;;  %s1044_s26 = sshll.u32 %s405_s9, 3 }
  0x63   : > { %s1045_s27 = sshll.u32 %s1502_s13, 7  ;;  %s1973_s0 = sld [smem:[#allocation21_spill]] }
  0x64   : > { %s1740_s28 = scalar_select %p57_p7, %s1494_s11, %s59_s18  }
  0x65   : > { %s409_s25 = scalar_lea.vmem [#allocation2], %s1044_s26  ;;  %p1751_p11 = pnand %p1181_p3, %p68_p5 }
  0x66   : > { %s417_s16 = sshll.u32 %s409_s25, 4  ;;  %s406_s24 = scalar_lea.sflag [#allocation3], %s405_s9  ;;  %s1747_s16 = int_to_ptr.vmem [resolvable:$true] %s417_s16 }
  0x67   : > { %p1328_p12 = pneg %p1751_p11 }
  0x69   : > { %s1745_s23 = scalar_lea.hbm %s1973_s0, %s1045_s27  ;;  %s1331_s26 = scalar_lea.hbm %s1973_s0, 256 }
  0x6a   : > { %s1326_s6 = scalar_lea.hbm %s1745_s23, 128  ;;  %p1332_p2 = scmp.lt.u32.totalorder %s1745_s23, %s1973_s0 }
  0x6b   : > { %p1327_p9 = scmp.ne.s32.totalorder %s1745_s23, %s1326_s6  ;;  %p1333_p4 = scmp.lt.u32.totalorder %s1331_s26, %s1326_s6 }
  0x6c   : > { %p1335_p13 = scmp.lt.u32.totalorder %s1326_s6, %s1745_s23 }
  0x6d   : > { %p1329_p0 = pnand %p1328_p12, %p1327_p9  ;;  %p1334_p8 = por %p1333_p4, %p1332_p2 }
  0x6f   : > { %p1330_p1 = pneg %p1329_p0  ;;  %p1336_p6 = por %p1335_p13, %p1334_p8 }
  0x71   : > { %p1337_p3 = pnand %p1336_p6, %p1330_p1 }
  0x73   : > { %1340 = shalt.err (!%p1337_p3)
}
  0x74   : > { %s1341_s9 = scalar_lea.vmem %s1747_s16, 128  ;;  %s1513_s20 = smov [#allocation2]  }
  0x75   : > { %p1342_p5 = scmp.ne.s32.totalorder %s1747_s16, %s1341_s9  ;;  %s1346_s25 = sshll.u32 %s1513_s20, 4  ;;  %s1347_s25 = int_to_ptr.vmem [resolvable:$false] %s1346_s25 }
  0x76   : > { %s1348_s18 = scalar_lea.vmem %s1347_s25, 256  ;;  %p1349_p0 = scmp.lt.s32.totalorder %s1747_s16, %s1347_s25 }
  0x77   : > { %p1344_p7 = pnand %p1342_p5, %p1328_p12  ;;  %p1350_p2 = scmp.lt.s32.totalorder %s1348_s18, %s1341_s9 }
  0x79   : > { %p1345_p9 = pneg %p1344_p7  ;;  %p1351_p4 = por %p1350_p2, %p1349_p0 }
  0x7b   : > { %p1352_p8 = pnand %p1351_p4, %p1345_p9 }
  0x7d   : > { %1355 = shalt.err (!%p1352_p8)
}
  0x7e   : > { %1167 = dma.hbm_to_vmem [thread:$0]  (!%p1751_p11), %s1745_s23, 128, %s1747_s16, %s406_s24  }
  0x7f   : > { %p1975_p1 = scmp.ne.s32.totalorder %s1968_s19, 0 }
  0x80   : > { %s1783_s6 = sand.u32 (!%p1975_p1), 1, %s1490_s10   ;;  %p1976_p12 = scmp.ne.s32.totalorder (!%p1975_p1), %s1965_s17, 0 }
  0x81   : > { %426 = sbr.rel (%p1975_p1) target bundleno = 432 (0x1b0), region = 48  ;;  %s1786_s30 = sshll.u32 (!%p1975_p1), %s1783_s6, 3 }
  0x82   : > { %s429_s26 = scalar_lea.sflag (!%p1975_p1), [#allocation3], %s1783_s6  ;;  %s432_s27 = scalar_lea.vmem (!%p1975_p1), [#allocation2], %s1786_s30 }
  0x88   : > { %1465 = dma.done.wait (%p1976_p12), %s429_s26, 128  }
  0x89   : > { %1467 = vsyncadd (%p1976_p12), %s429_s26, 4294967168  ;;  %p1977_p11 = scmp.eq.s32.totalorder %s1601_s15, 0 }
  0x8b   : > { %1469 = dma.done.wait (%p1977_p11), [#allocation6], 1024   ;;  %p1978_p13 = pmov %p1977_p11 }
  0x8c   : > { %p1979_p6 = pmov %p1977_p11 }
  0x8d   : > { %1471 = vsyncadd (%p1978_p13), [#allocation6], 4294966272 }
  0x8e   : > { %1473 = dma.done.wait (%p1979_p6), [#allocation9], 512   ;;  %p1980_p3 = pmov %p1979_p6 }
  0x8f   : > { %v1514_v0 = vmov 0.0|0.0   ;;  %vm1515_vm0 = vmmov 0   ;;  %v1516_v1 = vmov 0.0   ;;  %v508_v2 = vld [vmem:[#allocation5] sm:$0xff]  ;;  %v509_v3 = vld [vmem:[#allocation5 + $0x8] sm:$0xff]  ;;  %v510_v4 = vld [vmem:[#allocation5 + $0x10] sm:$0xff] }
  0x90   : > { %1475 = vsyncadd (%p1980_p3), [#allocation9], 4294966784  ;;  %1116 = vmatprep.subr.bf16.mxu0 %v1514_v0  ;;  %1122 = vmatprep.subr.bf16.mxu1 %v1514_v0  ;;  %v1117_v5 = vpack.c.bf16 %v509_v3, %v508_v2  ;;  %v511_v6 = vld [vmem:[#allocation5 + $0x18] sm:$0xff]  ;;  %v594_v7 = vld [vmem:[#allocation7] sm:$0xff]  ;;  %vm519_vm1 = vcmask 261120   ;;  %s1815_s16 = sshll.u32 %s1498_s12, 7 }
  0x91   : > { %1091 = vmatprep.mubr.msk.f32.mxu0 %vm1515_vm0, %v1516_v1  ;;  %1102 = vmatprep.mubr.msk.f32.mxu1 %vm1515_vm0, %v1516_v1  ;;  %v595_v8 = vld [vmem:[#allocation7 + $0x8] sm:$0xff]  ;;  %v1120_v10 = vpack.c.bf16 %v511_v6, %v510_v4  ;;  %v596_v11 = vld [vmem:[#allocation7 + $0x10] sm:$0xff]  ;;  %v597_v12 = vld [vmem:[#allocation7 + $0x18] sm:$0xff]  ;;  %s483_s21 = scalar_lea.vmem [#allocation10], %s1786_s30  ;;  %s490_s20 = scalar_lea.vmem [#allocation11], %s1786_s30 }
  0x92   : > { %v1123_v9 = vpack.c.bf16 %v595_v8, %v594_v7  ;;  %1118 = vmatpush3.bf16.msra.mxu0 %v1117_v5  ;;  %v676_v13 = vld [vmem:[#allocation8] sm:$0xff]  ;;  %v677_v14 = vld [vmem:[#allocation8 + $0x8] sm:$0xff]  ;;  %v1126_v15 = vpack.c.bf16 %v597_v12, %v596_v11  ;;  %v507_v16 = vld [vmem:[%s432_s27] sm:$0xff]  ;;  %s784_s24 = sshll.u32 %s483_s21, 4  ;;  %s799_s25 = sshll.u32 %s490_s20, 4  ;;  %s1828_s24 = int_to_ptr.vmem [resolvable:$true] %s784_s24  ;;  %s1836_s25 = int_to_ptr.vmem [resolvable:$true] %s799_s25 }
  0x93   : > { %1119 = vmatprep.subr.bf16.mxu0 %v1514_v0  ;;  %v1129_v17 = vpack.c.bf16 %v677_v14, %v676_v13  ;;  %v678_v18 = vld [vmem:[#allocation8 + $0x10] sm:$0xff]  ;;  %v679_v19 = vld [vmem:[#allocation8 + $0x18] sm:$0xff]  ;;  %s1826_s12 = scalar_lea.hbm %s1949_s7, %s1815_s16  ;;  %s1981_s23 = sld [smem:[#allocation23_spill]] }
  0x94   : > { %1124 = vmatpush3.bf16.msra.mxu1 %v1123_v9  ;;  %v1132_v20 = vpack.c.bf16 %v679_v19, %v678_v18  ;;  %v1054_v21 = vld [vmem:[%s1946_s4] ss:$0 sm:$0xff]  ;;  %s759_s9 = scalar_lea.sflag [#allocation4], %s1783_s6  ;;  %s1356_s18 = scalar_lea.vmem %s1828_s24, 128 }
  0x95   : > { %1125 = vmatprep.subr.bf16.mxu1 %v1514_v0  ;;  %v1056_v22 = vld [vmem:[%s1947_s5] ss:$0 sm:$0xff]  ;;  %p1357_p5 = scmp.ne.s32.totalorder %s1828_s24, %s1356_s18  ;;  %s1517_s26 = smov [#allocation10]  }
  0x96   : > { %1121 = vmatpush3.bf16.msra.mxu0 %v1120_v10  ;;  %s1360_s17 = sshll.u32 %s1517_s26, 4  ;;  %s1361_s17 = int_to_ptr.vmem [resolvable:$false] %s1360_s17 }
  0x97   : > { %1128 = vmatprep.subr.bf16.mxu0 %v1514_v0  ;;  %p1358_p7 = pnand %p1357_p5, %p1728_p10  ;;  %s1362_s0 = scalar_lea.vmem %s1361_s17, 256 }
  0x98   : > { %1127 = vmatpush3.bf16.msra.mxu1 %v1126_v15  ;;  %p1363_p0 = scmp.lt.s32.totalorder %s1828_s24, %s1361_s17  ;;  %p1364_p2 = scmp.lt.s32.totalorder %s1362_s0, %s1356_s18 }
  0x99   : > { %1092 = vmatmul.mubr.msk.f32.vlgmr.msra.gmra.mrb[0].mxu0 %vm519_vm1, %v507_v16  ;;  %s1834_s29 = scalar_lea.hbm %s1981_s23, %s1815_s16  ;;  %p1359_p9 = pneg %p1358_p7 }
  0x9a   : > { %1130 = vmatpush3.bf16.msra.mxu0 %v1129_v17  ;;  %1113 = vmatprep.mubr.msk.f32.mxu0 %vm1515_vm0, %v1516_v1  ;;  %p1365_p4 = por %p1364_p2, %p1363_p0 }
  0x9b   : > { %1103 = vmatmul.mubr.msk.f32.vlgmr.msra.gmra.mrb[0].mxu1 %vm519_vm1, %v507_v16  ;;  %1131 = vmatprep.subr.bf16.mxu0 %v1514_v0 }
  0x9c   : > { %p1366_p8 = pnand %p1365_p4, %p1359_p9 }
  0x9e   : > { %1133 = vmatpush3.bf16.msra.mxu0 %v1132_v20 }
  0xa1   : > { %1114 = vmatmul.mubr.msk.f32.vlgmr.msra.gmra.mrb[2].mxu0 %vm519_vm1, %v507_v16 }
 0x16c   : > { %v589_v23 = vpop.f32.mrb[0].mxu0 }
 0x16d   : > { %v590_v24 = vadd.f32 %v1054_v21, %v589_v23  ;;  %v1093_v25 = vpop.f32.mrb[1].mxu0 }
 0x16e   : > { %v671_v26 = vpop.f32.mrb[0].mxu1 }
 0x16f   : > { %v672_v27 = vadd.f32 %v1056_v22, %v671_v26  ;;  %v1104_v28 = vpop.f32.mrb[1].mxu1  ;;  %593 = vst.msk [vmem:[%s483_s21] sm:$0xff] %vm519_vm1, %v590_v24 }
 0x171   : > { %675 = vst.msk [vmem:[%s490_s20] sm:$0xff] %vm519_vm1, %v672_v27 }
 0x172   : > { %1369 = shalt.err (!%p1366_p8)
}
 0x173   : > { %s1370_s6 = scalar_lea.hbm %s1826_s12, 128  ;;  %s1374_s27 = scalar_lea.hbm %s1949_s7, 256 }
 0x174   : > { %p1371_p1 = scmp.ne.s32.totalorder %s1826_s12, %s1370_s6  ;;  %p1375_p13 = scmp.lt.u32.totalorder %s1826_s12, %s1949_s7 }
 0x175   : > { %p1376_p6 = scmp.lt.u32.totalorder %s1374_s27, %s1370_s6  ;;  %p1378_p5 = scmp.lt.u32.totalorder %s1370_s6, %s1826_s12 }
 0x176   : > { %p1372_p12 = pnand %p1371_p1, %p1728_p10 }
 0x177   : > { %p1377_p3 = por %p1376_p6, %p1375_p13 }
 0x178   : > { %p1373_p11 = pneg %p1372_p12 }
 0x179   : > { %p1379_p7 = por %p1378_p5, %p1377_p3 }
 0x17b   : > { %p1380_p9 = pnand %p1379_p7, %p1373_p11 }
 0x17d   : > { %1383 = shalt.err (!%p1380_p9)
}
 0x17e   : > { %1148 = dma.vmem_to_hbm [thread:$0]  (%p1728_p10), %s1828_s24, 128, %s1826_s12, %s759_s9  }
 0x17f   : > { %s1982_s0 = sand.u32 1, %s1601_s15   ;;  %s1384_s26 = scalar_lea.vmem %s1836_s25, 128 }
 0x180   : > { %s1864_s18 = scalar_lea.sflag [#allocation12], %s1982_s0  ;;  %p1385_p0 = scmp.ne.s32.totalorder %s1836_s25, %s1384_s26 }
 0x181   : > { %s1518_s6 = smov [#allocation11]  }
 0x182   : > { %p1386_p2 = pnand %p1385_p0, %p1728_p10  ;;  %s1388_s21 = sshll.u32 %s1518_s6, 4  ;;  %s1389_s21 = int_to_ptr.vmem [resolvable:$false] %s1388_s21 }
 0x183   : > { %s1390_s20 = scalar_lea.vmem %s1389_s21, 256  ;;  %p1391_p8 = scmp.lt.s32.totalorder %s1836_s25, %s1389_s21 }
 0x184   : > { %p1387_p4 = pneg %p1386_p2  ;;  %p1392_p1 = scmp.lt.s32.totalorder %s1390_s20, %s1384_s26 }
 0x186   : > { %p1393_p12 = por %p1392_p1, %p1391_p8 }
 0x188   : > { %p1394_p11 = pnand %p1393_p12, %p1387_p4 }
 0x18a   : > { %1397 = shalt.err (!%p1394_p11)
}
 0x18b   : > { %s1398_s15 = scalar_lea.hbm %s1834_s29, 128  ;;  %s1402_s9 = scalar_lea.hbm %s1981_s23, 256 }
 0x18c   : > { %p1399_p13 = scmp.ne.s32.totalorder %s1834_s29, %s1398_s15  ;;  %p1403_p5 = scmp.lt.u32.totalorder %s1834_s29, %s1981_s23 }
 0x18d   : > { %p1404_p7 = scmp.lt.u32.totalorder %s1402_s9, %s1398_s15  ;;  %p1406_p0 = scmp.lt.u32.totalorder %s1398_s15, %s1834_s29 }
 0x18e   : > { %p1400_p6 = pnand %p1399_p13, %p1728_p10 }
 0x18f   : > { %p1405_p9 = por %p1404_p7, %p1403_p5 }
 0x190   : > { %p1401_p3 = pneg %p1400_p6 }
 0x191   : > { %p1407_p2 = por %p1406_p0, %p1405_p9 }
 0x193   : > { %p1408_p4 = pnand %p1407_p2, %p1401_p3 }
 0x195   : > { %1411 = shalt.err (!%p1408_p4)
}
 0x196   : > { %1149 = dma.vmem_to_hbm [thread:$0]  (%p1728_p10), %s1836_s25, 128, %s1834_s29, %s1864_s18   ;;  %v753_v30 = vpop.f32.mrb[2].mxu0 }
 0x197   : > { %s1983_s26 = sld [smem:[#allocation22_spill]]  ;;  %s497_s6 = scalar_lea.vmem [#allocation13], %s1786_s30  ;;  %v1115_v32 = vpop.f32.mrb[3].mxu0 }
 0x198   : > { %s814_s21 = sshll.u32 %s497_s6, 4  ;;  %s1984_s24 = sld [smem:[#allocation24_spill]]  ;;  %s815_s21 = int_to_ptr.vmem [resolvable:$true] %s814_s21 }
 0x199   : > { %s1412_s9 = scalar_lea.vmem %s815_s21, 128  ;;  %s1519_s25 = smov [#allocation13]  }
 0x19a   : > { %p1413_p8 = scmp.ne.s32.totalorder %s815_s21, %s1412_s9  ;;  %s1416_s29 = sshll.u32 %s1519_s25, 4  ;;  %s1417_s29 = int_to_ptr.vmem [resolvable:$false] %s1416_s29 }
 0x19b   : > { %s1418_s30 = scalar_lea.vmem %s1417_s29, 256  ;;  %p1419_p11 = scmp.lt.s32.totalorder %s815_s21, %s1417_s29 }
 0x19c   : > { %p1414_p1 = pnand %p1413_p8, %p1728_p10  ;;  %p1420_p13 = scmp.lt.s32.totalorder %s1418_s30, %s1412_s9 }
 0x19d   : > { %v1058_v29 = vld [vmem:[%s1983_s26] ss:$0 sm:$0xff] }
 0x19e   : > { %v754_v31 = vadd.f32 %v1058_v29, %v753_v30  ;;  %s1896_s12 = scalar_lea.hbm %s1984_s24, %s1815_s16  ;;  %p1415_p12 = pneg %p1414_p1 }
 0x19f   : > { %p1421_p6 = por %p1420_p13, %p1419_p11 }
 0x1a0   : > { %757 = vst.msk [vmem:[%s497_s6] sm:$0xff] %vm519_vm1, %v754_v31 }
 0x1a1   : > { %p1422_p3 = pnand %p1421_p6, %p1415_p12 }
 0x1a3   : > { %1425 = shalt.err (!%p1422_p3)
}
 0x1a4   : > { %s1426_s16 = scalar_lea.hbm %s1896_s12, 128  ;;  %s1430_s17 = scalar_lea.hbm %s1984_s24, 256 }
 0x1a5   : > { %p1427_p5 = scmp.ne.s32.totalorder %s1896_s12, %s1426_s16  ;;  %p1431_p0 = scmp.lt.u32.totalorder %s1896_s12, %s1984_s24 }
 0x1a6   : > { %p1432_p2 = scmp.lt.u32.totalorder %s1430_s17, %s1426_s16  ;;  %p1434_p8 = scmp.lt.u32.totalorder %s1426_s16, %s1896_s12 }
 0x1a7   : > { %p1428_p7 = pnand %p1427_p5, %p1728_p10 }
 0x1a8   : > { %p1433_p4 = por %p1432_p2, %p1431_p0 }
 0x1a9   : > { %p1429_p9 = pneg %p1428_p7 }
 0x1aa   : > { %p1435_p1 = por %p1434_p8, %p1433_p4 }
 0x1ac   : > { %p1436_p12 = pnand %p1435_p1, %p1429_p9 }
 0x1ae   : > { %1439 = shalt.err (!%p1436_p12)
}
 0x1af   : > { %1150 = dma.vmem_to_hbm [thread:$0]  (%p1728_p10), %s815_s21, 128, %s1896_s12, %s1864_s18  }
 0x1b0 PF: > { %s1985_s6 = sld [smem:[#allocation19_spill]]  ;;  %s1986_s20 = sld [smem:[#allocation20_spill]] }
 0x1b1   : > { %p1988_p13 = scmp.ge.s32.totalorder %s1506_s14, 2 }
 0x1b6   : > { %s826_s15 = sand.u32 1, %s1985_s6   ;;  %p1987_p11 = scmp.ne.s32.totalorder %s1986_s20, 0 }
 0x1b7   : > { %s827_s9 = scalar_lea.sflag [#allocation4], %s826_s15 }
 0x1b8   : > { %p1169_p6 = pnand %p1988_p13, %p1987_p11 }
 0x1ba   : > { %1477 = dma.done.wait (!%p1169_p6), %s827_s9, 128  }
 0x1bb   : > { %1479 = vsyncadd (!%p1169_p6), %s827_s9, 4294967168  ;;  %s1989_s25 = sadd.s32 4294967294, %s1506_s14  }
 0x1bc   : > { %s835_s29 = sand.u32 1, %s1989_s25  }
 0x1bd   : > { %s836_s30 = scalar_lea.sflag [#allocation12], %s835_s29 }
 0x1be   : > { %1481 = dma.done.wait (!%p1169_p6), %s836_s30, 256  }
 0x1bf   : > { %1483 = vsyncadd (!%p1169_p6), %s836_s30, 4294967040  ;;  %s31_s14 = sadd.s32 1, %s1506_s14   ;;  %s1990_s30 = smov %s1490_s10 }
 0x1c0   : > { %p28_p10 = scmp.ge.s32.totalorder %s31_s14, 4   ;;  %s1991_s10 = smov %s1494_s11 }
 0x1c1   : > { %s1992_s11 = smov %s1740_s28  ;;  %s1993_s12 = smov %s1502_s13 }
 0x1c2   : > { %s1994_s13 = smov %s1996_s22  ;;  %30 = sbr.rel (!%p28_p10) target bundleno = 15 (0xf), region = 149 }
 0x1c9   :  { %850 = vsyncpa [#allocation3], 1 }
 0x1ca   :  { %852 = vsyncpa [#allocation3 + $0x1], 1 }
 0x1cb   :  { %853 = vsyncpa [#allocation6], 1 }
 0x1cc   :  { %854 = vsyncpa [#allocation9], 1 }
 0x1cd   :  { %855 = vsyncpa [#allocation4], 1 }
 0x1ce   :  { %857 = vsyncpa [#allocation4 + $0x1], 1 }
 0x1cf   :  { %858 = vsyncpa [#allocation12], 1 }
 0x1d0   :  { %860 = vsyncpa [#allocation12 + $0x1], 1 }

</bundles_post_ra>
